<compile_context>
chip_gen: v5e
topology: v5e:2x2
jax: 0.10.0
libtpu: 0.0.40
codegen_flags: <defaults>
</compile_context>

<pallas_src>
import functools

import jax
import jax.numpy as jnp
from jax.experimental import pallas as pl
from jax.experimental.pallas import tpu as pltpu

LEAKY_SLOPE = 0.01               # nn.LeakyReLU() default negative_slope
BN_EPS = 1e-5                    # nn.BatchNorm2d default eps
VMEM_LIMIT = 32 * 1024 * 1024    # <=50% of v7x physical VMEM; far above need


def _leaky(h):
    return jnp.where(h >= 0, h, LEAKY_SLOPE * h)


def _round_up(x, m):
    return ((x + m - 1) // m) * m


def _pick_tile(n, target):
    # Largest tile <= target, multiple of 16 so in-kernel (K, tn, C)->(K*tn, C)
    # collapses stay aligned to bf16 packed-sublane tiles (layout-preserving).
    return min(target, _round_up(n, 16))


# ----------------------------- Pallas kernels -------------------------------

def _edgeconv_kernel(x_ref, n_ref, w1c_ref, w1d_ref, b1_ref, w2_ref, b2_ref,
                     o_ref):
    # x_ref: (1, tn, C) bf16 center points; n_ref: (1, K, tn, C) bf16 neighbors.
    # Edge MLP on [x_i, x_j - x_i]:  e @ W1 == x_i @ W1c + (x_j - x_i) @ W1d,
    # so the K-times-redundant center half is never built in HBM and its matmul
    # runs once per tile.  Max over K reduced in-kernel (K folded into block).
    x = x_ref[0]                                                     # (tn, C)
    K = n_ref.shape[1]
    tn, C = x.shape
    d1 = w1c_ref.shape[1]
    d2 = w2_ref.shape[1]

    hc = jnp.dot(x, w1c_ref[...], preferred_element_type=jnp.float32)        # (tn, D1)
    diff = (n_ref[0] - x[None, :, :]).reshape(K * tn, C)                     # bf16
    hd = jnp.dot(diff, w1d_ref[...], preferred_element_type=jnp.float32)     # (K*tn, D1)
    h = _leaky(hd.reshape(K, tn, d1) + (hc + b1_ref[...])[None])
    h = jnp.dot(h.astype(w2_ref.dtype).reshape(K * tn, d1), w2_ref[...],
                preferred_element_type=jnp.float32) + b2_ref[...]
    h = _leaky(h).reshape(K, tn, d2)
    o_ref[0] = jnp.max(h, axis=0).astype(o_ref.dtype)                # max over K


def edgeconv_pallas(x, nbrs, p, *, tile_n=512, out_dtype=jnp.bfloat16):
    # x: (B, N, C) bf16 centers; nbrs: (B, K, N, C) bf16; returns (B, N, D2).
    B, K, N, C = nbrs.shape
    D1 = p["w1c"].shape[1]
    D2 = p["w2"].shape[1]
    tn = _pick_tile(N, tile_n)
    n_pad = _round_up(N, tn)
    if n_pad != N:
        x = jnp.pad(x, ((0, 0), (0, n_pad - N), (0, 0)))
        nbrs = jnp.pad(nbrs, ((0, 0), (0, 0), (0, n_pad - N), (0, 0)))
    n_tiles = n_pad // tn

    cost = pl.CostEstimate(
        flops=int(2 * B * n_pad * (C * D1 + K * (C * D1 + D1 * D2))),
        transcendentals=0,
        bytes_accessed=int(x.size * x.dtype.itemsize
                           + nbrs.size * nbrs.dtype.itemsize
                           + B * n_pad * D2 * jnp.dtype(out_dtype).itemsize
                           + 2 * (2 * C * D1 + D1 * D2)),
    )
    out = pl.pallas_call(
        _edgeconv_kernel,
        out_shape=jax.ShapeDtypeStruct((B, n_pad, D2), out_dtype),
        grid_spec=pltpu.PrefetchScalarGridSpec(
            num_scalar_prefetch=0,
            grid=(B, n_tiles),
            in_specs=[
                pl.BlockSpec((1, tn, C), lambda b, nt: (b, nt, 0)),
                pl.BlockSpec((1, K, tn, C), lambda b, nt: (b, 0, nt, 0)),
                pl.BlockSpec((C, D1), lambda b, nt: (0, 0)),
                pl.BlockSpec((C, D1), lambda b, nt: (0, 0)),
                pl.BlockSpec((1, D1), lambda b, nt: (0, 0)),
                pl.BlockSpec((D1, D2), lambda b, nt: (0, 0)),
                pl.BlockSpec((1, D2), lambda b, nt: (0, 0)),
            ],
            out_specs=pl.BlockSpec((1, tn, D2), lambda b, nt: (b, nt, 0)),
        ),
        compiler_params=pltpu.CompilerParams(
            dimension_semantics=("parallel", "parallel"),
            vmem_limit_bytes=VMEM_LIMIT,
        ),
        cost_estimate=cost,
    )(x, nbrs, p["w1c"], p["w1d"], p["b1"], p["w2"], p["b2"])
    return out[:, :N]


def _gkc_kernel(xn_ref, mut_ref, mm_ref, o_ref, *, inv_two_sigma2, inv_k):
    # Gaussian RBF response of each neighbor against learnable kernel centers,
    # averaged over the K neighbors (assumed GKC semantics).  K is folded into
    # the block; one (K*tn, C) matmul per grid step.
    xn = xn_ref[0]                                                   # (K, tn, C) bf16
    K, tn, C = xn.shape
    x = xn.reshape(K * tn, C)
    cross = jnp.dot(x, mut_ref[...], preferred_element_type=jnp.float32)     # (K*tn, O)
    xf = x.astype(jnp.float32)
    xx = jnp.sum(xf * xf, axis=-1, keepdims=True)                    # (K*tn, 1)
    d2 = jnp.maximum(xx + mm_ref[...] - 2.0 * cross, 0.0)            # clamp rounding
    # TODO(synk): on v6e/v7x cast d2 to bf16 before exp (bf16 EUP ~2x); keep f32 on v5e.
    r = jnp.exp(-d2 * inv_two_sigma2).reshape(K, tn, -1)
    o_ref[0] = (jnp.sum(r, axis=0) * inv_k).astype(o_ref.dtype)      # mean over K


def gkc_pallas(xnei, mu_t, mm, sigma, *, tile_n=512, out_dtype=jnp.bfloat16):
    # xnei: (B, K, N, C) bf16; mu_t: (C, O) bf16; mm: (1, O) f32 precomputed.
    # TODO(synk): a transposed (B, K, C, N) lane-dense layout would further cut
    # the VMEM/vreg lane waste of the C=3 input; not needed at current sizes.
    B, K, N, C = xnei.shape
    O = mu_t.shape[1]
    tn = _pick_tile(N, tile_n)
    n_pad = _round_up(N, tn)
    if n_pad != N:
        xnei = jnp.pad(xnei, ((0, 0), (0, 0), (0, n_pad - N), (0, 0)))
    n_tiles = n_pad // tn

    kern = functools.partial(_gkc_kernel,
                             inv_two_sigma2=1.0 / (2.0 * sigma * sigma),
                             inv_k=1.0 / K)
    cost = pl.CostEstimate(
        flops=int(2 * B * n_pad * K * C * O + 6 * B * n_pad * K * O),
        transcendentals=int(B * n_pad * K * O),
        bytes_accessed=int(xnei.size * xnei.dtype.itemsize + 2 * C * O
                           + B * n_pad * O * jnp.dtype(out_dtype).itemsize),
    )
    out = pl.pallas_call(
        kern,
        out_shape=jax.ShapeDtypeStruct((B, n_pad, O), out_dtype),
        grid_spec=pltpu.PrefetchScalarGridSpec(
            num_scalar_prefetch=0,
            grid=(B, n_tiles),
            in_specs=[
                pl.BlockSpec((1, K, tn, C), lambda b, nt: (b, 0, nt, 0)),
                pl.BlockSpec((C, O), lambda b, nt: (0, 0)),
                pl.BlockSpec((1, O), lambda b, nt: (0, 0)),
            ],
            out_specs=pl.BlockSpec((1, tn, O), lambda b, nt: (b, nt, 0)),
        ),
        compiler_params=pltpu.CompilerParams(
            dimension_semantics=("parallel", "parallel"),
            vmem_limit_bytes=VMEM_LIMIT,
        ),
        cost_estimate=cost,
    )(xnei, mu_t, mm)
    return out[:, :N]


def _head_kernel(x_ref, w1_ref, b1_ref, w2_ref, b2_ref, w3_ref, b3_ref, w4_ref,
                 o_ref):
    # conv1..conv3 (1x1, BN folded) + LeakyReLU, conv4 (1x1, no bias/BN),
    # running global max over the point-tile grid axis accumulated directly in
    # the resident lane-dense output block (== torch.max over dims 3 then 2).
    pt = pl.program_id(1)

    @pl.when(pt == 0)
    def _():
        o_ref[...] = jnp.full_like(o_ref, -jnp.inf)

    h = x_ref[0]                                                     # (tp, 2*m1) bf16
    h = _leaky(jnp.dot(h, w1_ref[...],
                       preferred_element_type=jnp.float32) + b1_ref[...])
    h = _leaky(jnp.dot(h.astype(w2_ref.dtype), w2_ref[...],
                       preferred_element_type=jnp.float32) + b2_ref[...])
    h = _leaky(jnp.dot(h.astype(w3_ref.dtype), w3_ref[...],
                       preferred_element_type=jnp.float32) + b3_ref[...])
    h = jnp.dot(h.astype(w4_ref.dtype), w4_ref[...],
                preferred_element_type=jnp.float32)                  # (tp, KKp)
    o_ref[0] = jnp.maximum(o_ref[0], jnp.max(h, axis=0, keepdims=True))


def head_pallas(feat, p, *, tile_p=512):
    # feat: (B, P, 2*m1) bf16; returns (B, k*k) f32 via lane-dense padded output.
    B, P, C0 = feat.shape
    C1 = p["w1"].shape[1]
    C2 = p["w2"].shape[1]
    C3 = p["w3"].shape[1]
    KKp = p["w4"].shape[1]
    KK = p["kk"]
    tp = _pick_tile(P, tile_p)
    p_pad = _round_up(P, tp)
    if p_pad != P:
        # Edge-replicate padded rows: duplicates never change a global max.
        feat = jnp.pad(feat, ((0, 0), (0, p_pad - P), (0, 0)), mode="edge")
    p_tiles = p_pad // tp

    cost = pl.CostEstimate(
        flops=int(2 * B * p_pad * (C0 * C1 + C1 * C2 + C2 * C3 + C3 * KKp)),
        transcendentals=0,
        bytes_accessed=int(feat.size * feat.dtype.itemsize
                           + 2 * (C0 * C1 + C1 * C2 + C2 * C3 + C3 * KKp)
                           + B * 8 * KKp * 4),
    )
    out = pl.pallas_call(
        _head_kernel,
        out_shape=jax.ShapeDtypeStruct((B, 8, KKp), jnp.float32),
        grid_spec=pltpu.PrefetchScalarGridSpec(
            num_scalar_prefetch=0,
            grid=(B, p_tiles),
            in_specs=[
                pl.BlockSpec((1, tp, C0), lambda b, t: (b, t, 0)),
                pl.BlockSpec((C0, C1), lambda b, t: (0, 0)),
                pl.BlockSpec((1, C1), lambda b, t: (0, 0)),
                pl.BlockSpec((C1, C2), lambda b, t: (0, 0)),
                pl.BlockSpec((1, C2), lambda b, t: (0, 0)),
                pl.BlockSpec((C2, C3), lambda b, t: (0, 0)),
                pl.BlockSpec((1, C3), lambda b, t: (0, 0)),
                pl.BlockSpec((C3, KKp), lambda b, t: (0, 0)),
            ],
            out_specs=pl.BlockSpec((1, 8, KKp), lambda b, t: (b, 0, 0)),
        ),
        compiler_params=pltpu.CompilerParams(
            dimension_semantics=("parallel", "arbitrary"),
            vmem_limit_bytes=VMEM_LIMIT,
        ),
        cost_estimate=cost,
    )(feat, p["w1"], p["b1"], p["w2"], p["b2"], p["w3"], p["b3"], p["w4"])
    return out[:, 0, :KK]


# ------------------------------ JAX glue -------------------------------------

def knn_indices(pts, k):
    # TODO(synk): dense (B,P,P) distances + top_k kept in JAX; a tiled Pallas
    # distance/top-k kernel would remove the dominant O(P^2) wrapper cost.
    sq = jnp.sum(pts * pts, axis=-1)
    d2 = sq[:, :, None] + sq[:, None, :] - 2.0 * jnp.einsum("bnc,bmc->bnm", pts, pts)
    _, idx = jax.lax.top_k(-d2, k)                      # nearest (incl. self)
    return idx                                          # (B, N, k)


def gather_neighbors_knc(pts, idx):
    # pts: (B, N, C), idx: (B, N, K) -> neighbors laid out (B, K, N, C) so the
    # kernels receive a contiguous (K, tile_n, C) slab per grid step.
    # TODO(synk): fuse this gather into the EdgeConv kernel via per-tile index
    # blocks + manual DMA from an ANY-space feature tensor to skip one HBM
    # round trip of the gathered tensor.
    idx_t = jnp.transpose(idx, (0, 2, 1))               # (B, K, N)
    return jax.vmap(lambda p, i: p[i])(pts, idx_t)      # (B, K, N, C)


def edge_conv(x, k, p, *, tile_n=512, out_dtype=jnp.bfloat16):
    # DGCNN-style EdgeConv: edge feature [x_i, x_j - x_i], shared 2-layer MLP
    # (1x1 conv + folded BN + LeakyReLU) in Pallas, max over the k neighbors.
    # Center half of the edge tensor is never materialized (split-W1 kernel).
    idx = knn_indices(x, k)
    nbrs = gather_neighbors_knc(x, idx).astype(jnp.bfloat16)        # (B, K, N, C)
    return edgeconv_pallas(x.astype(jnp.bfloat16), nbrs, p,
                           tile_n=tile_n, out_dtype=out_dtype)


def _bn_fold(c):
    # PyTorch BatchNorm2d defaults in eval mode: gamma=1, beta=0, mean=0, var=1.
    # TODO(synk): real checkpoints must fold their actual running stats here.
    gamma = jnp.ones((c,), jnp.float32)
    beta = jnp.zeros((c,), jnp.float32)
    mean = jnp.zeros((c,), jnp.float32)
    var = jnp.ones((c,), jnp.float32)
    scale = gamma / jnp.sqrt(var + BN_EPS)
    shift = beta - mean * scale
    return scale, shift


def make_params(key, input_dim, mlp):
    keys = jax.random.split(key, 16)

    def w(k_, i, o):
        return 0.1 * jax.random.normal(k_, (i, o), dtype=jnp.float32)

    def conv_bn(k_, i, o):
        # Fold eval-mode BN into the conv: layer becomes dot(x, w) + b.
        weight = w(k_, i, o)
        scale, shift = _bn_fold(o)
        return (weight * scale[None, :]).astype(jnp.bfloat16), shift[None, :]

    def edge_layer(k1, k2, k3, cin, d1, d2):
        # First edge conv acts on [x_i, x_j - x_i]; store W1 split into the
        # center / difference halves so the kernel never builds the edge tensor.
        scale1, shift1 = _bn_fold(d1)
        w1c = (w(k1, cin, d1) * scale1[None, :]).astype(jnp.bfloat16)
        w1d = (w(k2, cin, d1) * scale1[None, :]).astype(jnp.bfloat16)
        w2, b2 = conv_bn(k3, d1, d2)
        return dict(w1c=w1c, w1d=w1d, b1=shift1[None, :], w2=w2, b2=b2)

    m0, m1, m2, m3, m4 = mlp
    p = {}

    mu_bf = (0.5 * jax.random.normal(keys[0], (input_dim, m1),
                                     jnp.float32)).astype(jnp.bfloat16)
    muf = mu_bf.astype(jnp.float32)
    p["gkc_mu_t"] = mu_bf                                           # (C, O) bf16
    p["gkc_mm"] = jnp.sum(muf * muf, axis=0, keepdims=True)         # (1, O) f32

    p["ec1"] = edge_layer(keys[1], keys[2], keys[3], input_dim, m0, m0)
    p["ec2"] = edge_layer(keys[4], keys[5], keys[6], m0, m1, m1)

    hw1, hb1 = conv_bn(keys[7], 2 * m1, m2)
    hw2, hb2 = conv_bn(keys[8], m2, m3)
    hw3, hb3 = conv_bn(keys[9], m3, m4)
    kk = input_dim * input_dim
    kk_pad = _round_up(kk, 128)                                     # lane-dense output
    w4 = jnp.zeros((m4, kk_pad), jnp.float32).at[:, :kk].set(
        w(keys[10], m4, kk)).astype(jnp.bfloat16)
    p["head"] = dict(w1=hw1, b1=hb1, w2=hw2, b2=hb2, w3=hw3, b3=hb3,
                     w4=w4, kk=kk)
    return p


def tnetkd_forward(x, params, knn_k):
    bs, inp, c, n = x.shape
    P = c * n

    # xnei = knn_neighbors(x.reshape(bs, -1, c*n).permute(0, 2, 1))[1]
    pts = jnp.transpose(x.reshape(bs, inp, P), (0, 2, 1))            # (bs, P, inp)
    idx = knn_indices(pts, knn_k)
    xnei = gather_neighbors_knc(pts, idx).astype(jnp.bfloat16)       # (bs, k, P, inp)
    kernels = gkc_pallas(xnei, params["gkc_mu_t"], params["gkc_mm"],
                         sigma=1.0)                                  # (bs, P, m1) bf16

    # x = edgeconv2(edgeconv1(x.reshape(bs, c*n, -1)))
    # NOTE: raw reshape (not a transpose) matches torch's x.reshape exactly.
    h = edge_conv(x.reshape(bs, P, -1), knn_k, params["ec1"],
                  out_dtype=jnp.float32)          # f32: feeds ec2's kNN distances
    h = edge_conv(h, knn_k, params["ec2"], out_dtype=jnp.bfloat16)   # (bs, P, m1)

    # torch.cat([x.reshape(bs,-1,c,n), kernels.permute(0,2,1).reshape(bs,-1,c,n)], 1)
    # Both branches are point-major here, and the head convs are 1x1, so the
    # channel-wise cat per point is exactly a last-axis concat (no transposes).
    feat = jnp.concatenate([h, kernels], axis=-1)                    # (bs, P, 2*m1) bf16

    tvec = head_pallas(feat, params["head"])                         # (bs, inp*inp)
    iden = jnp.eye(inp, dtype=tvec.dtype).reshape(1, inp * inp)
    return (tvec + iden).reshape(bs, inp, inp)


if __name__ == "__main__":
    bs, inp, c, n = 2, 3, 4, 4          # x: (bs, input=3, c, n), P = c*n = 16 points
    mlp = [16, 32, 64, 64, 32]          # small stand-in for [64,128,1024,512,256]
    knn_k = 8

    key = jax.random.PRNGKey(0)
    kx, kp = jax.random.split(key)
    x = jax.random.normal(kx, (bs, inp, c, n), dtype=jnp.float32)
    params = make_params(kp, inp, mlp)

    out = tnetkd_forward(x, params, knn_k)
    out = jax.block_until_ready(out)
    assert out.shape == (bs, inp, inp) and out.dtype == jnp.float32
    print("KERNEL_OK")
</pallas_src>

<mosaic_0001>
module attributes {stable_mosaic.version = 11 : i64} {
  func.func @_gkc_kernel(%arg0: i32, %arg1: i32, %arg2: memref<1x8x16x3xbf16, #tpu.memory_space<vmem>>, %arg3: memref<3x32xbf16, #tpu.memory_space<vmem>>, %arg4: memref<1x32xf32, #tpu.memory_space<vmem>>, %arg5: memref<1x16x32xbf16, #tpu.memory_space<vmem>>) attributes {dimension_semantics = [#tpu.dimension_semantics<parallel>, #tpu.dimension_semantics<parallel>], iteration_bounds = array<i64: 2, 1>, scalar_prefetch = 0 : i64, scratch_operands = 0 : i64, tpu.core_type = #tpu.core_type<tc>, window_params = [{transform_indices = @transform_0, window_bounds = array<i64: 1, 8, 16, 3>}, {pipeline_mode = #tpu.pipeline_mode<synchronous>, transform_indices = @transform_1, window_bounds = array<i64: 3, 32>}, {pipeline_mode = #tpu.pipeline_mode<synchronous>, transform_indices = @transform_2, window_bounds = array<i64: 1, 32>}, {transform_indices = @transform_3, window_bounds = array<i64: 1, 16, 32>}]} {
    %c0 = arith.constant 0 : index
    %c0_0 = arith.constant 0 : index
    %c0_1 = arith.constant 0 : index
    %c0_2 = arith.constant 0 : index
    %0 = vector.load %arg2[%c0, %c0_0, %c0_1, %c0_2] : memref<1x8x16x3xbf16, #tpu.memory_space<vmem>>, vector<1x8x16x3xbf16>
    %1 = vector.shape_cast %0 : vector<1x8x16x3xbf16> to vector<8x16x3xbf16>
    %2 = vector.shape_cast %1 : vector<8x16x3xbf16> to vector<128x3xbf16>
    %c0_3 = arith.constant 0 : index
    %c0_4 = arith.constant 0 : index
    %3 = vector.load %arg3[%c0_3, %c0_4] : memref<3x32xbf16, #tpu.memory_space<vmem>>, vector<3x32xbf16>
    %cst = arith.constant dense<0.000000e+00> : vector<128x32xf32>
    %4 = tpu.matmul %2, %3, %cst {dimension_numbers = #tpu.dot_dimension_numbers<[1], [0], [0], [1], [0, 0, 1, 1], [], []>} : vector<128x3xbf16>, vector<3x32xbf16>, vector<128x32xf32> -> vector<128x32xf32>
    %5 = arith.extf %2 : vector<128x3xbf16> to vector<128x3xf32>
    %6 = arith.mulf %5, %5 : vector<128x3xf32>
    %cst_5 = arith.constant dense<0.000000e+00> : vector<128xf32>
    %7 = vector.multi_reduction <add>, %6, %cst_5 [1] : vector<128x3xf32> to vector<128xf32>
    %8 = vector.shape_cast %7 : vector<128xf32> to vector<128x1xf32>
    %c0_6 = arith.constant 0 : index
    %c0_7 = arith.constant 0 : index
    %9 = vector.load %arg4[%c0_6, %c0_7] : memref<1x32xf32, #tpu.memory_space<vmem>>, vector<1x32xf32>
    %10 = vector.broadcast %8 : vector<128x1xf32> to vector<128x32xf32>
    %11 = vector.broadcast %9 : vector<1x32xf32> to vector<128x32xf32>
    %12 = arith.addf %10, %11 : vector<128x32xf32>
    %cst_8 = arith.constant 2.000000e+00 : f32
    %13 = vector.broadcast %cst_8 : f32 to vector<128x32xf32>
    %14 = arith.mulf %13, %4 : vector<128x32xf32>
    %15 = arith.subf %12, %14 : vector<128x32xf32>
    %cst_9 = arith.constant 0.000000e+00 : f32
    %16 = vector.broadcast %cst_9 : f32 to vector<128x32xf32>
    %17 = arith.maximumf %15, %16 : vector<128x32xf32>
    %cst_10 = arith.constant 0.000000e+00 : f32
    %18 = vector.broadcast %cst_10 : f32 to vector<128x32xf32>
    %19 = arith.subf %18, %17 : vector<128x32xf32>
    %cst_11 = arith.constant 5.000000e-01 : f32
    %20 = vector.broadcast %cst_11 : f32 to vector<128x32xf32>
    %21 = arith.mulf %19, %20 : vector<128x32xf32>
    %22 = math.exp %21 : vector<128x32xf32>
    %23 = vector.shape_cast %22 : vector<128x32xf32> to vector<8x16x32xf32>
    %cst_12 = arith.constant dense<0.000000e+00> : vector<16x32xf32>
    %24 = vector.multi_reduction <add>, %23, %cst_12 [0] : vector<8x16x32xf32> to vector<16x32xf32>
    %cst_13 = arith.constant 1.250000e-01 : f32
    %25 = vector.broadcast %cst_13 : f32 to vector<16x32xf32>
    %26 = arith.mulf %24, %25 : vector<16x32xf32>
    %27 = arith.truncf %26 : vector<16x32xf32> to vector<16x32xbf16>
    %c0_14 = arith.constant 0 : index
    %c0_15 = arith.constant 0 : index
    %c0_16 = arith.constant 0 : index
    %28 = vector.load %arg5[%c0_14, %c0_15, %c0_16] : memref<1x16x32xbf16, #tpu.memory_space<vmem>>, vector<1x16x32xbf16>
    %29 = vector.shape_cast %28 : vector<1x16x32xbf16> to vector<16x32xbf16>
    %30 = vector.shape_cast %27 : vector<16x32xbf16> to vector<1x16x32xbf16>
    tpu.vector_store %arg5[%c0_14, %c0_15, %c0_16], %30 {strides = array<i32>} : memref<1x16x32xbf16, #tpu.memory_space<vmem>>, vector<1x16x32xbf16>,
    return
  }
  func.func @transform_0(%arg0: i32, %arg1: i32) -> (i32, i32, i32, i32) {
    %c0_i32 = arith.constant 0 : i32
    %c0_i32_0 = arith.constant 0 : i32
    %c0_i32_1 = arith.constant 0 : i32
    return %arg0, %c0_i32, %arg1, %c0_i32_0 : i32, i32, i32, i32
  }
  func.func @transform_1(%arg0: i32, %arg1: i32) -> (i32, i32) {
    %c0_i32 = arith.constant 0 : i32
    %c0_i32_0 = arith.constant 0 : i32
    %c0_i32_1 = arith.constant 0 : i32
    return %c0_i32, %c0_i32_0 : i32, i32
  }
  func.func @transform_2(%arg0: i32, %arg1: i32) -> (i32, i32) {
    %c0_i32 = arith.constant 0 : i32
    %c0_i32_0 = arith.constant 0 : i32
    %c0_i32_1 = arith.constant 0 : i32
    return %c0_i32, %c0_i32_0 : i32, i32
  }
  func.func @transform_3(%arg0: i32, %arg1: i32) -> (i32, i32, i32) {
    %c0_i32 = arith.constant 0 : i32
    %c0_i32_0 = arith.constant 0 : i32
    return %arg0, %arg1, %c0_i32 : i32, i32, i32
  }
}

</mosaic_0001>

<bundles_post_ra>
// kernel: tpu_custom_call.1
= control target key start
LH: loop header
LB: loop body
LE: loop exit
PB: predicated region body
PF: predicated region fallthrough
CT: control target
= control target key end

     0   :  { %8 = vsyncpa [#allocation3], 0  ;;  %s1133_s0 = inlined_call_operand.vmem [shape: bf16[2,8,16,3], index: 0, kind: input, shape index: {}]   ;;  %s1134_s1 = inlined_call_operand.vmem [shape: bf16[3,32], index: 1, kind: input, shape index: {}]   ;;  %s1135_s2 = inlined_call_operand.vmem [shape: f32[1,32], index: 2, kind: input, shape index: {}]   ;;  %s1136_s3 = inlined_call_operand.hbm [shape: bf16[2,16,32], index: 3, kind: output, shape index: {}]  }
   0x1   :  { %10 = vsyncpa [#allocation3 + $0x1], 0  ;;  %s946_s12 = smov 0   ;;  %s948_s13 = smov 0  }
   0x2   :  { %s950_s14 = smov 0   ;;  %s952_s15 = smov 0  }
   0x3   :  { %s954_s16 = smov 0   ;;  %s956_s17 = smov 0  }
   0x4 LB: > { %s686_s18 = sadd.s32 4294967295, %s921_s17   ;;  %s687_s19 = sadd.s32 4294967294, %s921_s17   ;;  %s921_s17 = sphi %s956_s17, %s16_s17   ;;  %s917_s16 = sphi %s954_s16, %s1143_s16   ;;  %s913_s15 = sphi %s952_s15, %s1142_s15   ;;  %s909_s14 = sphi %s950_s14, %s1141_s14   ;;  %s905_s13 = sphi %s948_s13, %s1140_s13   ;;  %s901_s12 = sphi %s946_s12, %s1139_s12  }
   0x5   : > { %s28_s20 = sadd.s32 1, %s917_s16  ;;  %s107_s21 = sadd.s32 1, %s909_s14 }
   0x6   : > { %p30_p0 = scmp.ge.s32.totalorder %s28_s20, 2  ;;  %p117_p1 = scmp.ne.s32.totalorder %s909_s14, %s905_s13 }
   0x7   : > { %p118_p2 = scmp.eq.s32.totalorder %s686_s18, 1  ;;  %p123_p3 = scmp.ne.s32.totalorder %s905_s13, %s901_s12 }
   0x8   : > { %s1145_s20 = smov (%p30_p0, %s28_s20), 0  ;;  %p124_p5 = scmp.eq.s32.totalorder %s687_s19, 1 }
   0x9   : > { %p986_p4 = por %p118_p2, %p117_p1  ;;  %s102_s23 = ssub.s32 %s917_s16, %s1145_s20 }
   0xa   : > { %p690_p6 = scmp.ge.s32.totalorder %s921_s17, 1  ;;  %p105_p7 = scmp.eq.s32.totalorder %s102_s23, 0 }
   0xb   : > { %p993_p8 = por %p124_p5, %p123_p3  ;;  %p161_p9 = scmp.lt.s32.totalorder %s921_s17, 3 }
   0xc   : > { %s999_s25 = scalar_select %p105_p7, %s909_s14, %s107_s21  }
   0xd   : > { %p162_p10 = pnand %p690_p6, %p161_p9 }
   0xe   : > { %p190_p11 = scmp.lt.s32.totalorder (!%p162_p10), %s913_s15, 1  ;;  %s186_s8 = sand.u32 (!%p162_p10), 1, %s905_s13  }
   0xf   : > { %165 = sbr.rel (%p162_p10) target bundleno = 221 (0xdd), region = 32  ;;  %s691_s9 = sshll.u32 (!%p162_p10), %s186_s8, 3 }
  0x10   : > { %s748_s10 = sshll.u32 (!%p162_p10), %s913_s15, 3  ;;  %s188_s21 = scalar_lea.vmem (!%p162_p10), [#allocation2], %s691_s9 }
  0x11   : > { %s603_s19 = scalar_lea.hbm (!%p162_p10), %s1136_s3, %s748_s10  ;;  %s590_s26 = scalar_lea.sflag (!%p162_p10), [#allocation3], %s186_s8 }
  0x12   : > { %s606_s23 = sshll.u32 (!%p162_p10), %s603_s19, 4  ;;  %s863_s4 = scalar_lea.hbm (!%p162_p10), %s1136_s3, 16  ;;  %s607_s23 = int_to_ptr.hbm [resolvable:$true] %s606_s23 }
  0x13   : > { %s857_s27 = sshra.s32 (!%p162_p10), %s607_s23, 4  ;;  %s858_s27 = int_to_ptr.hbm [resolvable:$true] %s857_s27 }
  0x14   : > { %v217_v0 = vld [vmem:[%s1134_s1] sm:$0x3]  ;;  %vm283_vm0 = vcmask 1040384   ;;  %vm284_vm1 = vcmask 1041408   ;;  %v923_v1 = vmov 65535   ;;  %s191_s28 = scalar_select %p190_p11, %s913_s15, 1 }
  0x15   : > { %v285_v2 = vsel %vm283_vm0, 4294967295, %v923_v1  ;;  %vm258_vm2 = vcmask 23552   ;;  %vm551_vm3 = vcmask 261120   ;;  %vm586_vm4 = vcmask 257024   ;;  %s604_s15 = sshll.u32 %s188_s21, 4  ;;  %p864_p1 = scmp.lt.s32.totalorder %s858_s27, %s1136_s3  ;;  %s605_s15 = int_to_ptr.vmem [resolvable:$true] %s604_s15 }
  0x16   : > { %v286_v3 = vsel %vm284_vm1, %v285_v2, 0  ;;  %s739_s29 = sshll.u32 %s191_s28, 6  ;;  %s859_s28 = scalar_lea.hbm %s858_s27, 8 }
  0x17   : > { %v288_v4 = vand.u32 %v286_v3, %v217_v0  ;;  %s1009_s5 = scalar_lea.vmem %s1133_s0, %s739_s29  ;;  %p860_p12 = scmp.ne.s32.totalorder %s858_s27, %s859_s28 }
  0x18   : > { %v740_v5 = vld [vmem:[%s1009_s5] sm:$0xff]  ;;  %v742_v6 = vld [vmem:[%s1009_s5 + $0x10] sm:$0xff]  ;;  %v203_v10 = vld [vmem:[%s1009_s5 + $0x8] sm:$0xff]   ;;  %p865_p2 = scmp.lt.s32.totalorder %s863_s4, %s859_s28 }
  0x19   : > { %297 = vmatpush.bf16.msra.mxu0 %v288_v4  ;;  %749 = vmatpush.bf16.msra.mxu1 %v288_v4  ;;  %v744_v7 = vld [vmem:[%s1009_s5 + $0x20] sm:$0xff]  ;;  %v746_v8 = vld [vmem:[%s1009_s5 + $0x30] sm:$0xff]  ;;  %v341_v12 = vunpack.c.l.bf16 %v203_v10  ;;  %v342_v18 = vunpack.c.h.bf16 %v203_v10  ;;  %v208_v28 = vld [vmem:[%s1009_s5 + $0x18] sm:$0xff]   ;;  %p861_p13 = pnand %p860_p12, %p986_p4 }
  0x1a   : > { %750 = vmatpush.bf16.msra.mxu2 %v288_v4  ;;  %751 = vmatpush.bf16.msra.mxu3 %v288_v4  ;;  %v205_v9 = vld [vmem:[%s1009_s5 + $0x10] sm:$0xff]   ;;  %v201_v13 = vld [vmem:[%s1009_s5] sm:$0xff]   ;;  %v346_v32 = vunpack.c.h.bf16 %v208_v28  ;;  %v345_v34 = vunpack.c.l.bf16 %v208_v28  ;;  %v741_v35 = vld [vmem:[%s1009_s5 + $0x8] sm:$0xff]  ;;  %p866_p3 = por %p865_p2, %p864_p1 }
  0x1b   : > { %v343_v11 = vunpack.c.l.bf16 %v205_v9  ;;  %v339_v14 = vunpack.c.l.bf16 %v201_v13  ;;  %v357_v16 = vmul.f32 %v341_v12, %v341_v12  ;;  %v344_v17 = vunpack.c.h.bf16 %v205_v9  ;;  %v209_v27 = vld [vmem:[%s1009_s5 + $0x20] sm:$0xff]   ;;  %v743_v36 = vld [vmem:[%s1009_s5 + $0x18] sm:$0xff]  ;;  %v745_v37 = vld [vmem:[%s1009_s5 + $0x28] sm:$0xff]  ;;  %p862_p0 = pneg %p861_p13 }
  0x1c   : > { %726 = vmatmul.msk.bf16.vlgmr.msra.gmra.mxu0 %vm258_vm2, %v740_v5  ;;  %728 = vmatmul.msk.bf16.vlgmr.msra.gmra.mxu1 %vm258_vm2, %v742_v6  ;;  %v340_v20 = vunpack.c.h.bf16 %v201_v13  ;;  %v358_v25 = vmul.f32 %v342_v18, %v342_v18  ;;  %v347_v31 = vunpack.c.l.bf16 %v209_v27  ;;  %v747_v38 = vld [vmem:[%s1009_s5 + $0x38] sm:$0xff]  ;;  %v362_v40 = vmul.f32 %v346_v32, %v346_v32  ;;  %v211_v42 = vld [vmem:[%s1009_s5 + $0x28] sm:$0xff]   ;;  %v213_v53 = vld [vmem:[%s1009_s5 + $0x30] sm:$0xf] }
  0x1d   : > { %730 = vmatmul.msk.bf16.vlgmr.msra.gmra.mxu2 %vm258_vm2, %v744_v7  ;;  %732 = vmatmul.msk.bf16.vlgmr.msra.gmra.mxu3 %vm258_vm2, %v746_v8  ;;  %v359_v15 = vmul.f32 %v343_v11, %v343_v11  ;;  %v355_v19 = vmul.f32 %v339_v14, %v339_v14  ;;  %v377_v22 = vsel %vm258_vm2, %v357_v16, 0.0  ;;  %v360_v24 = vmul.f32 %v344_v17, %v344_v17  ;;  %v214_v52 = vld [vmem:[%s1009_s5 + $0x34] sm:$0xff]   ;;  %v216_v63 = vld [vmem:[%s1009_s5 + $0x3c] sm:$0xf]  ;;  %v1055_v9 = vld [vmem:[%s1135_s2] ss:$0 sm:$0xff]  ;;  %p867_p5 = pnand %p866_p3, %p862_p0 }
  0x1e   : > { %378 = vadd.xlane.f32.xlu1 %v377_v22  ;;  %v356_v26 = vmul.f32 %v340_v20, %v340_v20  ;;  %v380_v30 = vsel %vm258_vm2, %v358_v25, 0.0  ;;  %v363_v39 = vmul.f32 %v347_v31, %v347_v31  ;;  %v361_v41 = vmul.f32 %v345_v34, %v345_v34 }
  0x1f   : > { %v383_v21 = vsel %vm258_vm2, %v359_v15, 0.0  ;;  %v371_v23 = vsel %vm258_vm2, %v355_v19, 0.0  ;;  %v386_v29 = vsel %vm258_vm2, %v360_v24, 0.0  ;;  %v392_v44 = vsel %vm258_vm2, %v362_v40, 0.0 }
  0x20   : > { %384 = vadd.xlane.f32.xlu2 %v383_v21  ;;  %372 = vadd.xlane.f32.xlu0 %v371_v23  ;;  %v374_v33 = vsel %vm258_vm2, %v356_v26, 0.0  ;;  %v395_v43 = vsel %vm258_vm2, %v363_v39, 0.0  ;;  %v349_v45 = vunpack.c.l.bf16 %v211_v42  ;;  %v350_v46 = vunpack.c.h.bf16 %v211_v42 }
  0x21   : > { %v389_v47 = vsel %vm258_vm2, %v361_v41, 0.0  ;;  %v348_v48 = vunpack.c.h.bf16 %v209_v27  ;;  %v352_v56 = vunpack.c.l.bf16 %v214_v52  ;;  %v353_v57 = vunpack.c.h.bf16 %v214_v52 }
  0x22   : > { %v365_v49 = vmul.f32 %v349_v45, %v349_v45  ;;  %v366_v50 = vmul.f32 %v350_v46, %v350_v46  ;;  %v351_v59 = vunpack.c.l.bf16 %v213_v53  ;;  %v354_v3 = vunpack.c.l.bf16 %v216_v63 }
  0x23   : > { %v364_v51 = vmul.f32 %v348_v48, %v348_v48  ;;  %v368_v60 = vmul.f32 %v352_v56, %v352_v56  ;;  %v369_v61 = vmul.f32 %v353_v57, %v353_v57 }
  0x24   : > { %v401_v54 = vsel %vm258_vm2, %v365_v49, 0.0  ;;  %v404_v55 = vsel %vm258_vm2, %v366_v50, 0.0  ;;  %v367_v62 = vmul.f32 %v351_v59, %v351_v59  ;;  %v370_v4 = vmul.f32 %v354_v3, %v354_v3 }
  0x25   : > { %v398_v58 = vsel %vm258_vm2, %v364_v51, 0.0  ;;  %v410_v0 = vsel %vm258_vm2, %v368_v60, 0.0  ;;  %v413_v1 = vsel %vm258_vm2, %v369_v61, 0.0 }
  0x26   : > { %381 = vadd.xlane.f32.xlu1 %v380_v30  ;;  %v407_v2 = vsel %vm258_vm2, %v367_v62, 0.0  ;;  %v416_v5 = vsel %vm258_vm2, %v370_v4, 0.0 }
  0x28   : > { %387 = vadd.xlane.f32.xlu2 %v386_v29  ;;  %375 = vadd.xlane.f32.xlu0 %v374_v33 }
  0x2c   : > { %727 = vmatmul.msk.bf16.gmra.mxu0 %vm258_vm2, %v741_v35  ;;  %729 = vmatmul.msk.bf16.gmra.mxu1 %vm258_vm2, %v743_v36 }
  0x2d   : > { %731 = vmatmul.msk.bf16.gmra.mxu2 %vm258_vm2, %v745_v37  ;;  %733 = vmatmul.msk.bf16.gmra.mxu3 %vm258_vm2, %v747_v38 }
  0x2e   : > { %393 = vadd.xlane.f32.xlu1 %v392_v44 }
  0x30   : > { %396 = vadd.xlane.f32.xlu2 %v395_v43  ;;  %390 = vadd.xlane.f32.xlu0 %v389_v47 }
  0x36   : > { %402 = vadd.xlane.f32.xlu1 %v401_v54 }
  0x38   : > { %405 = vadd.xlane.f32.xlu2 %v404_v55  ;;  %399 = vadd.xlane.f32.xlu0 %v398_v58 }
  0x3e   : > { %411 = vadd.xlane.f32.xlu1 %v410_v0 }
  0x40   : > { %414 = vadd.xlane.f32.xlu2 %v413_v1  ;;  %408 = vadd.xlane.f32.xlu0 %v407_v2 }
  0x48   : > { %417 = vadd.xlane.f32.xlu0 %v416_v5 }
  0x91   : > { %v379_v7 = vpop.xlane.xlu1 %378 }
  0x92   : > { %v425_v48 = vadd.f32 %v1055_v9, %v379_v7 }
  0x93   : > { %v385_v6 = vpop.xlane.xlu2 %384  ;;  %v373_v8 = vpop.xlane.xlu0 %372 }
  0x94   : > { %v427_v10 = vadd.f32 %v1055_v9, %v385_v6  ;;  %v423_v13 = vadd.f32 %v1055_v9, %v373_v8 }
  0x99   : > { %v299_v11 = vpop.f32.mrf.mxu0  ;;  %v309_v12 = vpop.f32.mrf.mxu1 }
  0x9a   : > { %v439_v14 = vmul.f32 2.0, %v299_v11  ;;  %v443_v15 = vmul.f32 2.0, %v309_v12  ;;  %v382_v19 = vpop.xlane.xlu1 %381 }
  0x9b   : > { %v388_v18 = vpop.xlane.xlu2 %387  ;;  %v376_v20 = vpop.xlane.xlu0 %375  ;;  %v426_v63 = vadd.f32 %v1055_v9, %v382_v19 }
  0x9c   : > { %v455_v16 = vsub.f32 %v423_v13, %v439_v14  ;;  %v459_v17 = vsub.f32 %v427_v10, %v443_v15  ;;  %v428_v24 = vadd.f32 %v1055_v9, %v388_v18  ;;  %v424_v30 = vadd.f32 %v1055_v9, %v376_v20 }
  0x9e   : > { %v471_v21 = vmax.f32 %v455_v16, 0.0  ;;  %v475_v23 = vmax.f32 %v459_v17, 0.0 }
  0xa0   : > { %v487_v22 = vsub.f32 0.0, %v471_v21  ;;  %v319_v25 = vpop.f32.mrf.mxu2  ;;  %v329_v26 = vpop.f32.mrf.mxu3  ;;  %v491_v33 = vsub.f32 0.0, %v475_v23 }
  0xa1   : > { %v301_v27 = vpop.f32.mrf.mxu0  ;;  %v311_v28 = vpop.f32.mrf.mxu1  ;;  %v447_v38 = vmul.f32 2.0, %v319_v25  ;;  %v1065_v3 = vmul.f32 2.0, %v329_v26 }
  0xa2   : > { %v503_v29 = vmul.f32 0.5, %v487_v22  ;;  %v440_v31 = vmul.f32 2.0, %v301_v27  ;;  %v444_v32 = vmul.f32 2.0, %v311_v28  ;;  %v394_v37 = vpop.xlane.xlu1 %393  ;;  %v507_v45 = vmul.f32 0.5, %v491_v33 }
  0xa3   : > { %v397_v36 = vpop.xlane.xlu2 %396  ;;  %v391_v40 = vpop.xlane.xlu0 %390  ;;  %v430_v4 = vadd.f32 %v1055_v9, %v394_v37 }
  0xa4   : > { %v456_v34 = vsub.f32 %v424_v30, %v440_v31  ;;  %v460_v35 = vsub.f32 %v428_v24, %v444_v32  ;;  %v431_v39 = vadd.f32 %v1055_v9, %v397_v36  ;;  %v519_v41 = vmul.f32 1.442695, %v503_v29 }
  0xa5   : > { %v429_v54 = vadd.f32 %v1055_v9, %v391_v40  ;;  %v527_v58 = vmul.f32 1.442695, %v507_v45 }
  0xa6   : > { %v472_v42 = vmax.f32 %v456_v34, 0.0  ;;  %v476_v43 = vmax.f32 %v460_v35, 0.0  ;;  %v463_v44 = vsub.f32 %v431_v39, %v447_v38  ;;  %811 = vpow2.f32 %v519_v41 }
  0xa7   : > { %813 = vpow2.f32 %v527_v58 }
  0xa8   : > { %v321_v46 = vpop.f32.mrf.mxu2  ;;  %v331_v47 = vpop.f32.mrf.mxu3  ;;  %v488_v49 = vsub.f32 0.0, %v472_v42  ;;  %v492_v50 = vsub.f32 0.0, %v476_v43  ;;  %v479_v51 = vmax.f32 %v463_v44, 0.0 }
  0xa9   : > { %v304_v52 = vpop.f32.mrf.mxu0  ;;  %v314_v53 = vpop.f32.mrf.mxu1  ;;  %v448_v8 = vmul.f32 2.0, %v321_v46  ;;  %v452_v13 = vmul.f32 2.0, %v331_v47 }
  0xaa   : > { %v441_v55 = vmul.f32 2.0, %v304_v52  ;;  %v445_v56 = vmul.f32 2.0, %v314_v53  ;;  %v495_v57 = vsub.f32 0.0, %v479_v51  ;;  %v403_v61 = vpop.xlane.xlu1 %402  ;;  %v504_v0 = vmul.f32 0.5, %v488_v49 }
  0xab   : > { %v406_v62 = vpop.xlane.xlu2 %405  ;;  %v508_v1 = vmul.f32 0.5, %v492_v50  ;;  %v400_v2 = vpop.xlane.xlu0 %399  ;;  %v433_v10 = vadd.f32 %v1055_v9, %v403_v61 }
  0xac   : > { %v457_v59 = vsub.f32 %v425_v48, %v441_v55  ;;  %v461_v60 = vsub.f32 %v429_v54, %v445_v56  ;;  %v511_v7 = vmul.f32 0.5, %v495_v57  ;;  %v432_v11 = vadd.f32 %v1055_v9, %v400_v2  ;;  %v812_v12 = vpop.eup %811 }
  0xad   : > { %v521_v17 = vmul.f32 1.442695, %v504_v0  ;;  %v529_v18 = vmul.f32 1.442695, %v508_v1  ;;  %v552_v27 = vsel %vm551_vm3, %v812_v12, 0.0  ;;  %v814_v41 = vpop.eup %813  ;;  %v434_v42 = vadd.f32 %v1055_v9, %v406_v62 }
  0xae   : > { %v473_v5 = vmax.f32 %v457_v59, 0.0  ;;  %v477_v6 = vmax.f32 %v461_v60, 0.0  ;;  %v464_v19 = vsub.f32 %v432_v11, %v448_v8  ;;  %v535_v28 = vmul.f32 1.442695, %v511_v7 }
  0xaf   : > { %815 = vpow2.f32 %v521_v17  ;;  %v555_v17 = vsel %vm551_vm3, %v814_v41, 0.0 }
  0xb0   : > { %v489_v14 = vsub.f32 0.0, %v473_v5  ;;  %v493_v15 = vsub.f32 0.0, %v477_v6  ;;  %v324_v16 = vpop.f32.mrf.mxu2  ;;  %v480_v29 = vmax.f32 %v464_v19, 0.0  ;;  %v334_v31 = vpop.f32.mrf.mxu3 }
  0xb1   : > { %v449_v20 = vmul.f32 2.0, %v324_v16  ;;  %v306_v21 = vpop.f32.mrf.mxu0  ;;  %v316_v22 = vpop.f32.mrf.mxu1  ;;  %v453_v47 = vmul.f32 2.0, %v334_v31 }
  0xb2   : > { %v505_v23 = vmul.f32 0.5, %v489_v14  ;;  %v509_v24 = vmul.f32 0.5, %v493_v15  ;;  %v442_v25 = vmul.f32 2.0, %v306_v21  ;;  %v446_v26 = vmul.f32 2.0, %v316_v22  ;;  %v412_v36 = vpop.xlane.xlu1 %411 }
  0xb3   : > { %v465_v30 = vsub.f32 %v433_v10, %v449_v20  ;;  %v496_v37 = vsub.f32 0.0, %v480_v29  ;;  %v436_v39 = vadd.f32 %v1055_v9, %v412_v36  ;;  %v409_v40 = vpop.xlane.xlu0 %408  ;;  %v415_v45 = vpop.xlane.xlu2 %414 }
  0xb4   : > { %v523_v32 = vmul.f32 1.442695, %v505_v23  ;;  %v531_v33 = vmul.f32 1.442695, %v509_v24  ;;  %v458_v34 = vsub.f32 %v426_v63, %v442_v25  ;;  %v462_v35 = vsub.f32 %v430_v4, %v446_v26 }
  0xb5   : > { %v481_v38 = vmax.f32 %v465_v30, 0.0  ;;  %v468_v48 = vsub.f32 %v436_v39, %v452_v13  ;;  %v435_v51 = vadd.f32 %v1055_v9, %v409_v40  ;;  %v512_v53 = vmul.f32 0.5, %v496_v37  ;;  %v816_v61 = vpop.eup %815 }
  0xb6   : > { %817 = vpow2.f32 %v523_v32  ;;  %v474_v43 = vmax.f32 %v458_v34, 0.0  ;;  %v478_v44 = vmax.f32 %v462_v35, 0.0  ;;  %v437_v56 = vadd.f32 %v1055_v9, %v415_v45 }
  0xb7   : > { %819 = vpow2.f32 %v535_v28  ;;  %v497_v46 = vsub.f32 0.0, %v481_v38  ;;  %v484_v55 = vmax.f32 %v468_v48, 0.0  ;;  %v467_v59 = vsub.f32 %v435_v51, %v1065_v3 }
  0xb8   : > { %821 = vpow2.f32 %v531_v33  ;;  %v490_v49 = vsub.f32 0.0, %v474_v43  ;;  %v494_v50 = vsub.f32 0.0, %v478_v44  ;;  %v326_v52 = vpop.f32.mrf.mxu2  ;;  %v469_v0 = vsub.f32 %v437_v56, %v453_v47  ;;  %v336_v12 = vpop.f32.mrf.mxu3 }
  0xb9   : > { %v513_v54 = vmul.f32 0.5, %v497_v46  ;;  %v450_v60 = vmul.f32 2.0, %v326_v52  ;;  %823 = vpow2.f32 %v529_v18  ;;  %v500_v63 = vsub.f32 0.0, %v484_v55 }
  0xba   : > { %v506_v57 = vmul.f32 0.5, %v490_v49  ;;  %v510_v58 = vmul.f32 0.5, %v494_v50  ;;  %v483_v5 = vmax.f32 %v467_v59, 0.0  ;;  %v537_v10 = vmul.f32 1.442695, %v512_v53 }
  0xbb   : > { %v539_v62 = vmul.f32 1.442695, %v513_v54  ;;  %v466_v6 = vsub.f32 %v434_v42, %v450_v60  ;;  %v485_v11 = vmax.f32 %v469_v0, 0.0  ;;  %v418_v13 = vpop.xlane.xlu0 %417  ;;  %v516_v15 = vmul.f32 0.5, %v500_v63 }
  0xbc   : > { %v818_v1 = vpop.eup %817  ;;  %v525_v2 = vmul.f32 1.442695, %v506_v57  ;;  %v533_v4 = vmul.f32 1.442695, %v510_v58  ;;  %v499_v16 = vsub.f32 0.0, %v483_v5  ;;  %v454_v22 = vmul.f32 2.0, %v336_v12 }
  0xbd   : > { %v820_v7 = vpop.eup %819  ;;  %v553_v8 = vsel %vm551_vm3, %v818_v1, 0.0  ;;  %825 = vpow2.f32 %v539_v62  ;;  %v501_v18 = vsub.f32 0.0, %v485_v11  ;;  %v482_v19 = vmax.f32 %v466_v6, 0.0 }
  0xbe   : > { %v822_v3 = vpop.eup %821  ;;  %v554_v14 = vadd.f32 %v553_v8, %v552_v27  ;;  %827 = vpow2.f32 %v525_v2  ;;  %v515_v21 = vmul.f32 0.5, %v499_v16  ;;  %v438_v23 = vadd.f32 %v1055_v9, %v418_v13 }
  0xbf   : > { %829 = vpow2.f32 %v533_v4  ;;  %v824_v24 = vpop.eup %823  ;;  %v557_v25 = vsel %vm551_vm3, %v822_v3, 0.0  ;;  %v517_v26 = vmul.f32 0.5, %v501_v18  ;;  %v498_v28 = vsub.f32 0.0, %v482_v19 }
  0xc0   : > { %v556_v20 = vadd.f32 %v555_v17, %v554_v14  ;;  %831 = vpow2.f32 %v537_v10  ;;  %v545_v29 = vmul.f32 1.442695, %v516_v15  ;;  %v543_v30 = vmul.f32 1.442695, %v515_v21 }
  0xc1   : > { %v470_v31 = vsub.f32 %v438_v23, %v454_v22  ;;  %v559_v33 = vsel %vm551_vm3, %v820_v7, 0.0  ;;  %v547_v34 = vmul.f32 1.442695, %v517_v26  ;;  %v514_v35 = vmul.f32 0.5, %v498_v28 }
  0xc2   : > { %v558_v27 = vadd.f32 %v557_v25, %v556_v20  ;;  %v567_v37 = vsel %vm551_vm3, %v816_v61, 0.0  ;;  %833 = vpow2.f32 %v543_v30  ;;  %v570_v46 = vsel %vm551_vm3, %v824_v24, 0.0 }
  0xc3   : > { %v826_v32 = vpop.eup %825  ;;  %v486_v9 = vmax.f32 %v470_v31, 0.0  ;;  %835 = vpow2.f32 %v547_v34  ;;  %v541_v42 = vmul.f32 1.442695, %v514_v35 }
  0xc4   : > { %v828_v36 = vpop.eup %827  ;;  %v560_v38 = vadd.f32 %v559_v33, %v558_v27  ;;  %v561_v40 = vsel %vm551_vm3, %v826_v32, 0.0  ;;  %837 = vpow2.f32 %v545_v29 }
  0xc5   : > { %v830_v39 = vpop.eup %829  ;;  %v568_v41 = vsel %vm551_vm3, %v828_v36, 0.0  ;;  %v502_v44 = vsub.f32 0.0, %v486_v9  ;;  %839 = vpow2.f32 %v541_v42 }
  0xc6   : > { %v569_v43 = vadd.f32 %v568_v41, %v567_v37  ;;  %v832_v45 = vpop.eup %831  ;;  %v562_v47 = vadd.f32 %v561_v40, %v560_v38  ;;  %v572_v50 = vsel %vm551_vm3, %v830_v39, 0.0 }
  0xc7   : > { %v518_v49 = vmul.f32 0.5, %v502_v44  ;;  %v574_v55 = vsel %vm551_vm3, %v832_v45, 0.0 }
  0xc8   : > { %v571_v48 = vadd.f32 %v570_v46, %v569_v43  ;;  %v834_v51 = vpop.eup %833 }
  0xc9   : > { %v549_v53 = vmul.f32 1.442695, %v518_v49  ;;  %v836_v54 = vpop.eup %835  ;;  %v563_v56 = vsel %vm551_vm3, %v834_v51, 0.0 }
  0xca   : > { %v573_v52 = vadd.f32 %v572_v50, %v571_v48  ;;  %v838_v57 = vpop.eup %837  ;;  %v564_v58 = vadd.f32 %v563_v56, %v562_v47  ;;  %v565_v59 = vsel %vm551_vm3, %v836_v54, 0.0 }
  0xcb   : > { %841 = vpow2.f32 %v549_v53  ;;  %v840_v61 = vpop.eup %839  ;;  %v578_v1 = vsel %vm551_vm3, %v838_v57, 0.0 }
  0xcc   : > { %v575_v60 = vadd.f32 %v574_v55, %v573_v52  ;;  %v566_v62 = vadd.f32 %v565_v59, %v564_v58  ;;  %v576_v63 = vsel %vm551_vm3, %v840_v61, 0.0 }
  0xce   : > { %v577_v0 = vadd.f32 %v576_v63, %v575_v60  ;;  %v582_v2 = vmul.f32 0.125, %v566_v62 }
  0xd0   : > { %v579_v4 = vadd.f32 %v578_v1, %v577_v0  ;;  %v584_v6 = vpack.c.bf16 %v582_v2, %v582_v2 }
  0xd1   : > { %v842_v5 = vpop.eup %841 }
  0xd2   : > { %v580_v7 = vsel %vm551_vm3, %v842_v5, 0.0  ;;  %587 = vst.msk [vmem:[%s188_s21] sm:$0xf] %vm586_vm4, %v584_v6 }
  0xd3   : > { %v581_v8 = vadd.f32 %v580_v7, %v579_v4 }
  0xd5   : > { %v583_v10 = vmul.f32 0.125, %v581_v8 }
  0xd7   : > { %v585_v11 = vpack.c.bf16 %v583_v10, %v583_v10 }
  0xd9   : > { %588 = vst.msk [vmem:[%s188_s21 + $0x4] sm:$0xf] %vm586_vm4, %v585_v11 }
  0xda   : > { %870 = shalt.err (!%p867_p5)
}
  0xdb   : > { %s924_s7 = smov 64   ;;  %s925_s8 = smov 4  }
  0xdc   : > { %752 = dma.vmem_to_hbm [thread:$0]  (%p986_p4), %s605_s15, 128, %s607_s23, %s590_s26, %s924_s7, %s924_s7, %s925_s8  }
  0xdd PF: > { %p758_p6 = scmp.ge.s32.totalorder %s921_s17, 2  ;;  %s621_s9 = sand.u32 1, %s901_s12  }
  0xde   : > { %s622_s10 = scalar_lea.sflag [#allocation3], %s621_s9 }
  0xdf   : > { %p755_p7 = pnand %p758_p6, %p993_p8 }
  0xe1   : > { %p756_p9 = pneg %p755_p7 }
  0xe3   : > { %896 = dma.done.wait (%p756_p9), %s622_s10, 128  }
  0xe4   : > { %898 = vsyncadd (%p756_p9), %s622_s10, 4294967168  ;;  %s16_s17 = sadd.s32 1, %s921_s17   ;;  %s1139_s12 = smov %s905_s13 }
  0xe5   : > { %p13_p10 = scmp.ge.s32.totalorder %s16_s17, 4   ;;  %s1140_s13 = smov %s909_s14 }
  0xe6   : > { %s1141_s14 = smov %s999_s25  ;;  %s1142_s15 = smov %s917_s16 }
  0xe7   : > { %s1143_s16 = smov %s1145_s20  ;;  %15 = sbr.rel (!%p13_p10) target bundleno = 4 (0x4), region = 67 }
  0xec   :  { %628 = vsyncpa [#allocation3], 1 }
  0xed   :  { %630 = vsyncpa [#allocation3 + $0x1], 1 }

</bundles_post_ra>
